<compile_context>
chip_gen: v5e
topology: v5e:2x2
jax: 0.10.0
libtpu: 0.0.40
codegen_flags: <defaults>
</compile_context>

<pallas_src>
import jax
import jax.numpy as jnp
from jax import lax
from jax.experimental import pallas as pl
from jax.experimental.pallas import tpu as pltpu

# ---- static problem configuration (small synthetic sizes) ----
N = 16          # number of graph nodes
M = 24          # number of line-graph nodes (rows of feat_b, cols of pm_pd)
IN_FEATS = 8
OUT_FEATS = 16  # must be even (split into halves)
RADIUS = 3
BN_EPS = 1e-5
N_PROJ = 3 + RADIUS          # prev, deg, fuse + RADIUS radius projections
K_CAT = N_PROJ * IN_FEATS    # fused contraction dim (48)


def lgnn_core_kernel(feat_a_ref, feat_b_ref, deg_ref, adj_ref, pmpd_ref,
                     w_cat_ref, bn_ref, out_ref):
    fa = feat_a_ref[...]                      # [N, IN]
    adj = adj_ref[...]                        # [N, N]

    # aggregate_radius power products: A^1 x, A^2 x, A^4 x (RADIUS = 3).
    # Serial MXU depth 3 (A2 -> A4 -> z3); z1/z2/z3 issue back-to-back.
    a2 = jnp.dot(adj, adj, preferred_element_type=jnp.float32)   # A^2
    a4 = jnp.dot(a2, a2, preferred_element_type=jnp.float32)     # A^4
    z1 = jnp.dot(adj, fa, preferred_element_type=jnp.float32)    # A^1 x
    z2 = jnp.dot(a2, fa, preferred_element_type=jnp.float32)     # A^2 x
    z3 = jnp.dot(a4, fa, preferred_element_type=jnp.float32)     # A^4 x

    # fuse term input: pm_pd @ feat_b                              [N, IN]
    fuse_in = jnp.dot(pmpd_ref[...], feat_b_ref[...],
                      preferred_element_type=jnp.float32)

    # Single fused projection: X_cat [N, 6*IN] @ W_cat [6*IN, OUT] + b_total.
    # Column order must match the wrapper's weight concatenation order.
    x_cat = jnp.concatenate(
        [fa, deg_ref[...] * fa, z1, z2, z3, fuse_in], axis=1)      # [N, 48]
    result = (jnp.dot(x_cat, w_cat_ref[...],
                      preferred_element_type=jnp.float32)
              + bn_ref[0:1, :])                                    # [N, OUT]

    # result = cat([result[:, :n], relu(result[:, n:])], dim=1)
    # (kept as iota+where: stays in one vreg on the VPU, no lane shuffles)
    half = OUT_FEATS // 2
    col = lax.broadcasted_iota(jnp.int32, result.shape, 1)
    result = jnp.where(col < half, result, jnp.maximum(result, 0.0))

    # BatchNorm1d (training mode): batch statistics over the node dim,
    # biased variance, eps = 1e-5.
    mean = jnp.mean(result, axis=0, keepdims=True)
    var = jnp.mean((result - mean) ** 2, axis=0, keepdims=True)
    normed = (result - mean) * lax.rsqrt(var + BN_EPS)
    out_ref[...] = normed * bn_ref[1:2, :] + bn_ref[2:3, :]


def pack_params(params):
    """Pre-concatenate weights / biases so the kernel sees 2 param tensors."""
    w_cat = jnp.concatenate(
        [params["w_prev"], params["w_deg"]]
        + [params["w_rad"][i] for i in range(RADIUS)]
        + [params["w_fuse"]],
        axis=0)                                                    # [6*IN, OUT]
    b_total = (params["b_prev"] + params["b_deg"] + params["b_fuse"]
               + jnp.sum(params["b_rad"], axis=0))                 # [1, OUT]
    bn_pack = jnp.concatenate(
        [b_total, params["gamma"], params["beta"]], axis=0)        # [3, OUT]
    return w_cat, bn_pack


def lgnn_core_forward(feat_a, feat_b, deg, adj, pm_pd, params):
    w_cat, bn_pack = pack_params(params)
    inputs = (feat_a, feat_b, deg, adj, pm_pd, w_cat, bn_pack)

    # Advisory cost hint so XLA schedules this tiny custom call sensibly.
    flops = 2 * (2 * N * N * N                # A2, A4
                 + 3 * N * N * IN_FEATS       # z1, z2, z3
                 + N * M * IN_FEATS           # pm_pd @ feat_b
                 + N * K_CAT * OUT_FEATS)     # fused projection
    bytes_accessed = sum(int(x.size) * 4 for x in inputs) + N * OUT_FEATS * 4
    cost = pl.CostEstimate(flops=flops, transcendentals=OUT_FEATS,
                           bytes_accessed=bytes_accessed)

    vmem_spec = pl.BlockSpec(memory_space=pltpu.MemorySpace.VMEM)
    return pl.pallas_call(
        lgnn_core_kernel,
        out_shape=jax.ShapeDtypeStruct((N, OUT_FEATS), jnp.float32),
        in_specs=[vmem_spec] * len(inputs),
        out_specs=vmem_spec,
        cost_estimate=cost,
    )(*inputs)
    # TODO(synk): if multiple graphs are processed per step, add a batch grid
    # axis marked "parallel" (shards across v7x's two TensorCores) with a
    # lane-dense batched output slab.


def make_params(key):
    ks = jax.random.split(key, 10)
    def lin(kw, kb):
        w = jax.random.normal(kw, (IN_FEATS, OUT_FEATS), jnp.float32) * 0.1
        b = jax.random.normal(kb, (1, OUT_FEATS), jnp.float32) * 0.1
        return w, b
    w_prev, b_prev = lin(ks[0], ks[1])
    w_deg, b_deg = lin(ks[2], ks[3])
    w_fuse, b_fuse = lin(ks[4], ks[5])
    w_rad = jax.random.normal(ks[6], (RADIUS, IN_FEATS, OUT_FEATS), jnp.float32) * 0.1
    b_rad = jax.random.normal(ks[7], (RADIUS, 1, OUT_FEATS), jnp.float32) * 0.1
    gamma = jnp.ones((1, OUT_FEATS), jnp.float32)
    beta = jnp.zeros((1, OUT_FEATS), jnp.float32)
    return dict(w_prev=w_prev, b_prev=b_prev, w_deg=w_deg, b_deg=b_deg,
                w_rad=w_rad, b_rad=b_rad, w_fuse=w_fuse, b_fuse=b_fuse,
                gamma=gamma, beta=beta)


def lgnn_core_reference(feat_a, feat_b, deg, adj, pm_pd, params):
    """Pure-JAX reference (un-fused), matches the PyTorch module semantics."""
    prev_proj = feat_a @ params["w_prev"] + params["b_prev"]
    deg_proj = (deg * feat_a) @ params["w_deg"] + params["b_deg"]
    z = adj @ feat_a
    radius_proj = z @ params["w_rad"][0] + params["b_rad"][0]
    for i in range(1, RADIUS):
        for _ in range(2 ** (i - 1)):
            z = adj @ z
        radius_proj = radius_proj + z @ params["w_rad"][i] + params["b_rad"][i]
    fuse = (pm_pd @ feat_b) @ params["w_fuse"] + params["b_fuse"]
    result = prev_proj + deg_proj + radius_proj + fuse
    half = OUT_FEATS // 2
    result = jnp.concatenate(
        [result[:, :half], jnp.maximum(result[:, half:], 0.0)], axis=1)
    mean = jnp.mean(result, axis=0, keepdims=True)
    var = jnp.mean((result - mean) ** 2, axis=0, keepdims=True)
    normed = (result - mean) * lax.rsqrt(var + BN_EPS)
    return normed * params["gamma"] + params["beta"]


if __name__ == "__main__":
    key = jax.random.PRNGKey(0)
    k_feat_a, k_feat_b, k_pm, k_adj, k_params = jax.random.split(key, 5)

    feat_a = jax.random.normal(k_feat_a, (N, IN_FEATS), jnp.float32)
    feat_b = jax.random.normal(k_feat_b, (M, IN_FEATS), jnp.float32)
    pm_pd = jax.random.normal(k_pm, (N, M), jnp.float32) * 0.1

    # deterministic synthetic directed graph: ring + a few random edges
    adj = jnp.zeros((N, N), jnp.float32)
    ring_src = jnp.arange(N)
    ring_dst = (jnp.arange(N) + 1) % N
    adj = adj.at[ring_dst, ring_src].set(1.0)              # adj[dst, src] = 1
    extra = (jax.random.uniform(k_adj, (N, N)) < 0.15).astype(jnp.float32)
    adj = jnp.clip(adj + extra, 0.0, 1.0)
    adj = adj * (1.0 - jnp.eye(N, dtype=jnp.float32))      # no self loops
    deg = jnp.sum(adj, axis=1, keepdims=True)              # in-degree per node [N,1]

    params = make_params(k_params)

    out = lgnn_core_forward(feat_a, feat_b, deg, adj, pm_pd, params)
    jax.block_until_ready(out)
    assert out.shape == (N, OUT_FEATS)

    ref = lgnn_core_reference(feat_a, feat_b, deg, adj, pm_pd, params)
    assert jnp.allclose(out, ref, rtol=2e-3, atol=2e-3), "mismatch vs. reference"

    print("KERNEL_OK")
</pallas_src>

<mosaic_0001>
module attributes {stable_mosaic.version = 11 : i64} {
  func.func @lgnn_core_kernel(%arg0: memref<16x8xf32, #tpu.memory_space<vmem>>, %arg1: memref<24x8xf32, #tpu.memory_space<vmem>>, %arg2: memref<16x1xf32, #tpu.memory_space<vmem>>, %arg3: memref<16x16xf32, #tpu.memory_space<vmem>>, %arg4: memref<16x24xf32, #tpu.memory_space<vmem>>, %arg5: memref<48x16xf32, #tpu.memory_space<vmem>>, %arg6: memref<3x16xf32, #tpu.memory_space<vmem>>, %arg7: memref<16x16xf32, #tpu.memory_space<vmem>>) attributes {dimension_semantics = [], scalar_prefetch = 0 : i64, scratch_operands = 0 : i64, tpu.core_type = #tpu.core_type<tc>} {
    %c0 = arith.constant 0 : index
    %c0_0 = arith.constant 0 : index
    %0 = vector.load %arg0[%c0, %c0_0] : memref<16x8xf32, #tpu.memory_space<vmem>>, vector<16x8xf32>
    %c0_1 = arith.constant 0 : index
    %c0_2 = arith.constant 0 : index
    %1 = vector.load %arg3[%c0_1, %c0_2] : memref<16x16xf32, #tpu.memory_space<vmem>>, vector<16x16xf32>
    %cst = arith.constant dense<0.000000e+00> : vector<16x16xf32>
    %2 = tpu.matmul %1, %1, %cst {dimension_numbers = #tpu.dot_dimension_numbers<[1], [0], [0], [1], [0, 0, 1, 1], [], []>} : vector<16x16xf32>, vector<16x16xf32>, vector<16x16xf32> -> vector<16x16xf32>
    %cst_3 = arith.constant dense<0.000000e+00> : vector<16x16xf32>
    %3 = tpu.matmul %2, %2, %cst_3 {dimension_numbers = #tpu.dot_dimension_numbers<[1], [0], [0], [1], [0, 0, 1, 1], [], []>} : vector<16x16xf32>, vector<16x16xf32>, vector<16x16xf32> -> vector<16x16xf32>
    %cst_4 = arith.constant dense<0.000000e+00> : vector<16x8xf32>
    %4 = tpu.matmul %1, %0, %cst_4 {dimension_numbers = #tpu.dot_dimension_numbers<[1], [0], [0], [1], [0, 0, 1, 1], [], []>} : vector<16x16xf32>, vector<16x8xf32>, vector<16x8xf32> -> vector<16x8xf32>
    %cst_5 = arith.constant dense<0.000000e+00> : vector<16x8xf32>
    %5 = tpu.matmul %2, %0, %cst_5 {dimension_numbers = #tpu.dot_dimension_numbers<[1], [0], [0], [1], [0, 0, 1, 1], [], []>} : vector<16x16xf32>, vector<16x8xf32>, vector<16x8xf32> -> vector<16x8xf32>
    %cst_6 = arith.constant dense<0.000000e+00> : vector<16x8xf32>
    %6 = tpu.matmul %3, %0, %cst_6 {dimension_numbers = #tpu.dot_dimension_numbers<[1], [0], [0], [1], [0, 0, 1, 1], [], []>} : vector<16x16xf32>, vector<16x8xf32>, vector<16x8xf32> -> vector<16x8xf32>
    %c0_7 = arith.constant 0 : index
    %c0_8 = arith.constant 0 : index
    %7 = vector.load %arg4[%c0_7, %c0_8] : memref<16x24xf32, #tpu.memory_space<vmem>>, vector<16x24xf32>
    %c0_9 = arith.constant 0 : index
    %c0_10 = arith.constant 0 : index
    %8 = vector.load %arg1[%c0_9, %c0_10] : memref<24x8xf32, #tpu.memory_space<vmem>>, vector<24x8xf32>
    %cst_11 = arith.constant dense<0.000000e+00> : vector<16x8xf32>
    %9 = tpu.matmul %7, %8, %cst_11 {dimension_numbers = #tpu.dot_dimension_numbers<[1], [0], [0], [1], [0, 0, 1, 1], [], []>} : vector<16x24xf32>, vector<24x8xf32>, vector<16x8xf32> -> vector<16x8xf32>
    %c0_12 = arith.constant 0 : index
    %c0_13 = arith.constant 0 : index
    %10 = vector.load %arg2[%c0_12, %c0_13] : memref<16x1xf32, #tpu.memory_space<vmem>>, vector<16x1xf32>
    %11 = vector.broadcast %10 : vector<16x1xf32> to vector<16x8xf32>
    %12 = arith.mulf %11, %0 : vector<16x8xf32>
    %13 = tpu.concatenate %0, %12, %4, %5, %6, %9 in 1 : vector<16x8xf32>, vector<16x8xf32>, vector<16x8xf32>, vector<16x8xf32>, vector<16x8xf32>, vector<16x8xf32> -> vector<16x48xf32>
    %c0_14 = arith.constant 0 : index
    %c0_15 = arith.constant 0 : index
    %14 = vector.load %arg5[%c0_14, %c0_15] : memref<48x16xf32, #tpu.memory_space<vmem>>, vector<48x16xf32>
    %cst_16 = arith.constant dense<0.000000e+00> : vector<16x16xf32>
    %15 = tpu.matmul %13, %14, %cst_16 {dimension_numbers = #tpu.dot_dimension_numbers<[1], [0], [0], [1], [0, 0, 1, 1], [], []>} : vector<16x48xf32>, vector<48x16xf32>, vector<16x16xf32> -> vector<16x16xf32>
    %c0_17 = arith.constant 0 : index
    %c0_18 = arith.constant 0 : index
    %16 = vector.load %arg6[%c0_17, %c0_18] : memref<3x16xf32, #tpu.memory_space<vmem>>, vector<1x16xf32>
    %17 = vector.broadcast %16 : vector<1x16xf32> to vector<16x16xf32>
    %18 = arith.addf %15, %17 : vector<16x16xf32>
    %19 = tpu.iota {dimensions = array<i32: 1>} : vector<16x16xi32>
    %c8_i32 = arith.constant 8 : i32
    %20 = vector.broadcast %c8_i32 : i32 to vector<16x16xi32>
    %21 = arith.cmpi slt, %19, %20 : vector<16x16xi32>
    %cst_19 = arith.constant 0.000000e+00 : f32
    %22 = vector.broadcast %cst_19 : f32 to vector<16x16xf32>
    %23 = arith.maximumf %18, %22 : vector<16x16xf32>
    %24 = arith.select %21, %18, %23 : vector<16x16xi1>, vector<16x16xf32>
    %cst_20 = arith.constant dense<0.000000e+00> : vector<16xf32>
    %25 = vector.multi_reduction <add>, %24, %cst_20 [0] : vector<16x16xf32> to vector<16xf32>
    %26 = vector.shape_cast %25 : vector<16xf32> to vector<1x16xf32>
    %cst_21 = arith.constant 1.600000e+01 : f32
    %27 = vector.broadcast %cst_21 : f32 to vector<1x16xf32>
    %28 = arith.divf %26, %27 : vector<1x16xf32>
    %29 = vector.broadcast %28 : vector<1x16xf32> to vector<16x16xf32>
    %30 = arith.subf %24, %29 : vector<16x16xf32>
    %31 = arith.mulf %30, %30 : vector<16x16xf32>
    %cst_22 = arith.constant dense<0.000000e+00> : vector<16xf32>
    %32 = vector.multi_reduction <add>, %31, %cst_22 [0] : vector<16x16xf32> to vector<16xf32>
    %33 = vector.shape_cast %32 : vector<16xf32> to vector<1x16xf32>
    %cst_23 = arith.constant 1.600000e+01 : f32
    %34 = vector.broadcast %cst_23 : f32 to vector<1x16xf32>
    %35 = arith.divf %33, %34 : vector<1x16xf32>
    %36 = vector.broadcast %28 : vector<1x16xf32> to vector<16x16xf32>
    %37 = arith.subf %24, %36 : vector<16x16xf32>
    %cst_24 = arith.constant 9.99999974E-6 : f32
    %38 = vector.broadcast %cst_24 : f32 to vector<1x16xf32>
    %39 = arith.addf %35, %38 : vector<1x16xf32>
    %40 = math.rsqrt %39 : vector<1x16xf32>
    %41 = vector.broadcast %40 : vector<1x16xf32> to vector<16x16xf32>
    %42 = arith.mulf %37, %41 : vector<16x16xf32>
    %c1 = arith.constant 1 : index
    %c0_25 = arith.constant 0 : index
    %43 = vector.load %arg6[%c1, %c0_25] : memref<3x16xf32, #tpu.memory_space<vmem>>, vector<1x16xf32>
    %44 = vector.broadcast %43 : vector<1x16xf32> to vector<16x16xf32>
    %45 = arith.mulf %42, %44 : vector<16x16xf32>
    %c2 = arith.constant 2 : index
    %c0_26 = arith.constant 0 : index
    %46 = vector.load %arg6[%c2, %c0_26] : memref<3x16xf32, #tpu.memory_space<vmem>>, vector<1x16xf32>
    %47 = vector.broadcast %46 : vector<1x16xf32> to vector<16x16xf32>
    %48 = arith.addf %45, %47 : vector<16x16xf32>
    %c0_27 = arith.constant 0 : index
    %c0_28 = arith.constant 0 : index
    %49 = vector.load %arg7[%c0_27, %c0_28] : memref<16x16xf32, #tpu.memory_space<vmem>>, vector<16x16xf32>
    tpu.vector_store %arg7[%c0_27, %c0_28], %48 {strides = array<i32>} : memref<16x16xf32, #tpu.memory_space<vmem>>, vector<16x16xf32>,
    return
  }
}

</mosaic_0001>

<bundles_post_ra>
// kernel: tpu_custom_call.1
= control target key start
LH: loop header
LB: loop body
LE: loop exit
PB: predicated region body
PF: predicated region fallthrough
CT: control target
= control target key end

     0   :  { %vm31_vm0 = vcmask 130048   ;;  %v443_v5 = vmov 0   ;;  %s602_s0 = inlined_call_operand.vmem [shape: f32[16,8], index: 0, kind: input, shape index: {}]   ;;  %s603_s1 = inlined_call_operand.vmem [shape: f32[24,8], index: 1, kind: input, shape index: {}]   ;;  %s604_s2 = inlined_call_operand.vmem [shape: f32[16,1], index: 2, kind: input, shape index: {}]   ;;  %s605_s3 = inlined_call_operand.vmem [shape: f32[16,16], index: 3, kind: input, shape index: {}]   ;;  %s606_s4 = inlined_call_operand.vmem [shape: f32[16,24], index: 4, kind: input, shape index: {}]   ;;  %s607_s5 = inlined_call_operand.vmem [shape: f32[48,16], index: 5, kind: input, shape index: {}]   ;;  %s608_s6 = inlined_call_operand.vmem [shape: f32[3,16], index: 6, kind: input, shape index: {}]   ;;  %s609_s7 = inlined_call_operand.hbm [shape: f32[16,16], index: 7, kind: output, shape index: {}]  }
   0x1   :  { %v30_v0 = vld [vmem:[%s605_s3 + $0x8] sm:$0xff]  ;;  %v29_v1 = vld [vmem:[%s605_s3] sm:$0xff]  ;;  %409 = vset.pattern.permute.xlu0 %v443_v5 }
   0x2   :  { %v501_v2 = vld [vmem:[%s602_s0 + $0x8] sm:$0xff]  ;;  %52 = vmatpush.msra.mxu0 %v30_v0  ;;  %398 = vmatpush.msra.mxu3 %v30_v0  ;;  %v506_v3 = vld [vmem:[%s602_s0] sm:$0xff] }
   0x3   :  { %v200_v4 = vld [vmem:[%s604_s2] sm:$0xff]  ;;  %104 = vmatpush.msra.mxu2 %v501_v2 }
   0x4   :  { %12 = vsyncpa [#allocation3], 0  ;;  %53 = vmatpush.msra.mxu0 %v29_v1  ;;  %399 = vmatpush.msra.mxu3 %v29_v1  ;;  %v201_v7 = vld [vmem:[%s604_s2 + $0x8] sm:$0xff]  ;;  %s444_s11 = smov 8   ;;  %v169_v11 = vld [vmem:[%s603_s1 + $0x10] sm:$0xff]  ;;  %s445_s15 = smov 16   ;;  %v305_v56 = vlaneseq }
   0x5   :  { %384 = vmatmul.msk.f32.vlgmr.msra.gmra.mxu0 %vm31_vm0, %v29_v1  ;;  %385 = vmatmul.msk.f32.vlgmr.msra.gmra.mxu3 %vm31_vm0, %v30_v0  ;;  %v168_v13 = vld [vmem:[%s603_s1 + $0x8] sm:$0xff]  ;;  %v167_v14 = vld [vmem:[%s603_s1] sm:$0xff]  ;;  %vm170_vm1 = vcmask 195584   ;;  %s446_s22 = smov 24   ;;  %s447_s1 = smov 40   ;;  %v270_v26 = vld [vmem:[%s607_s5 + $0x18] sm:$0xff] }
   0x6   :  { %105 = vmatpush.msra.mxu2 %v506_v3  ;;  %204 = vperm.xlu0 %409, %v200_v4   ;;  %v165_v15 = vld [vmem:[%s606_s4] sm:$0xff]  ;;  %v166_v16 = vld [vmem:[%s606_s4 + $0x8] sm:$0xff]  ;;  %v269_v27 = vld [vmem:[%s607_s5 + $0x10] sm:$0xff]  ;;  %s448_s30 = smov 32   ;;  %vm254_vm2 = vcmask 64512   ;;  %vm261_vm3 = vcmask 261120  }
   0x7   :  { %388 = vmatmul.msk.f32.vlgmr.msra.gmra.mxu2 %vm31_vm0, %v29_v1  ;;  %127 = vmatpush.msrb.mxu3 %v501_v2  ;;  %v272_v24 = vld [vmem:[%s607_s5 + $0x28] sm:$0xff]  ;;  %v271_v25 = vld [vmem:[%s607_s5 + $0x20] sm:$0xff]  ;;  %vm264_vm4 = vcmask 326656   ;;  %vm275_vm5 = vcmask 392192   ;;  %v449_v57 = vmov 16.0   ;;  %v306_v59 = vand.u32 127, %v305_v56 }
   0x8   :  { %156 = vmatpush.msrb.mxu0 %v501_v2  ;;  %292 = vmatpush.msrb.mxu2 %v272_v24  ;;  %v268_v32 = vld [vmem:[%s607_s5 + $0x8] sm:$0xff]  ;;  %v267_v33 = vld [vmem:[%s607_s5] sm:$0xff]  ;;  %413 = vrcp.f32 %v449_v57  ;;  %s372_s19 = sshll.u32 %s609_s7, 4  ;;  %s451_s20 = smov 128   ;;  %s373_s19 = int_to_ptr.hbm [resolvable:$true] %s372_s19 }
   0x9   :  { %128 = vmatpush.msrb.mxu3 %v506_v3  ;;  %v410_v54 = vld [vmem:[%s608_s6] ss:$0 sm:$0xff]  ;;  %vm307_vm6 = vcmp.lt.s32.totalorder %v306_v59, 8 }
   0xa   :  { %157 = vmatpush.msrb.mxu0 %v506_v3  ;;  %293 = vmatpush.msrb.mxu2 %v271_v25 }
   0xc   :  { %294 = vmatpush.msrb.mxu2 %v270_v26 }
   0xe   :  { %209 = vperm.xlu0 %409, %v201_v7   ;;  %295 = vmatpush.msrb.mxu2 %v269_v27  ;;  %v414_v60 = vpop.eup %413 }
   0xf   :  { %389 = vmatmul.msk.f32.gmra.mxu2 %vm31_vm0, %v30_v0  ;;  %v322_v0 = vmul.f32 16.0, %v414_v60  ;;  %vm326_vm7 = vweird.f32 %v414_v60 }
  0x10   :  { %296 = vmatpush.msrb.mxu2 %v268_v32 }
  0x12   :  { %297 = vmatpush.msrb.mxu2 %v267_v33 }
  0x78   :  { %v205_v6 = vpop.permute.xlu0 %204 }
  0x79   :  { %v212_v8 = vmul.f32 %v205_v6, %v506_v3  ;;  %v323_v6 = vsub.f32 1.0, %v322_v0 }
  0x7b   :  { %216 = vrot.lane.b32.xlu1 %v212_v8, %s444_s11 }
  0x80   :  { %v210_v22 = vpop.permute.xlu0 %209 }
  0x81   :  { %v213_v23 = vmul.f32 %v210_v22, %v501_v2 }
  0x82   :  { %v55_v9 = vpop.f32.mrf.mxu0 }
  0x83   :  { %390 = vmatmul.msk.f32.vlgmr.msrb.gmra.mxu3 %vm31_vm0, %v55_v9 }
  0x88   :  { %v58_v10 = vpop.f32.mrf.mxu3 }
  0x89   :  { %81 = vmatpush.msra.mxu1 %v58_v10 }
  0x8a   :  { %v107_v12 = vpop.f32.mrf.mxu2 }
  0x8b   :  { %82 = vmatpush.msra.mxu1 %v55_v9  ;;  %391 = vmatmul.msk.f32.gmra.mxu3 %vm31_vm0, %v58_v10 }
  0x8c   :  { %386 = vmatmul.msk.f32.vlgmr.msra.gmra.mxu1 %vm31_vm0, %v55_v9  ;;  %224 = vrot.lane.b32.xlu1 %v107_v12, %s445_s15  ;;  %v324_v9 = vmul.f32 %v414_v60, %v323_v6 }
  0x8d   :  { %190 = vmatpush.msrb.mxu1 %v169_v11 }
  0x8e   :  { %v325_v12 = vadd.f32 %v414_v60, %v324_v9 }
  0x8f   :  { %191 = vmatpush.msrb.mxu1 %v168_v13 }
  0x91   :  { %192 = vmatpush.msrb.mxu1 %v167_v14 }
  0x92   :  { %v110_v29 = vpop.f32.mrf.mxu2 }
  0x94   :  { %387 = vmatmul.msk.f32.gmra.mxu1 %vm31_vm0, %v58_v10  ;;  %218 = vrot.lane.b32.xlu1 %v213_v23, %s444_s11 }
  0x9c   :  { %394 = vmatmul.msk.f32.vlgmr.msrb.gmra.mxu1 %vm170_vm1, %v165_v15  ;;  %v327_v15 = vsel %vm326_vm7, %v414_v60, %v325_v12 }
  0xa4   :  { %395 = vmatmul.msk.f32.gmra.mxu1 %vm170_vm1, %v166_v16 }
  0xed   :  { %v217_v34 = vpop.permute.xlu1 %216 }
  0xee   :  { %v255_v36 = vsel %vm254_vm2, %v506_v3, %v217_v34 }
  0xfe   :  { %v225_v37 = vpop.permute.xlu1 %224 }
  0xff   :  { %v257_v38 = vsel %vm31_vm0, %v255_v36, %v225_v37 }
 0x106   :  { %v130_v17 = vpop.f32.mrf.mxu3  ;;  %v219_v44 = vpop.permute.xlu1 %218 }
 0x107   :  { %232 = vrot.lane.b32.xlu2 %v130_v17, %s446_s22  ;;  %v256_v46 = vsel %vm254_vm2, %v501_v2, %v219_v44 }
 0x109   :  { %v84_v18 = vpop.f32.mrf.mxu1 }
 0x10a   :  { %392 = vmatmul.msk.f32.vlgmr.msrb.gmra.mxu0 %vm31_vm0, %v84_v18 }
 0x10e   :  { %v133_v21 = vpop.f32.mrf.mxu3 }
 0x111   :  { %v87_v19 = vpop.f32.mrf.mxu1 }
 0x112   :  { %393 = vmatmul.msk.f32.gmra.mxu0 %vm31_vm0, %v87_v19 }
 0x119   :  { %v194_v20 = vpop.f32.mrf.mxu1 }
 0x11a   :  { %248 = vrot.lane.b32.xlu0 %v194_v20, %s447_s1 }
 0x121   :  { %v197_v31 = vpop.f32.mrf.mxu1 }
 0x122   :  { %234 = vrot.lane.b32.xlu0 %v133_v21, %s446_s22 }
 0x161   :  { %v233_v35 = vpop.permute.xlu2 %232 }
 0x162   :  { %v259_v39 = vsel %vm170_vm1, %v257_v38, %v233_v35 }
 0x187   :  { %v159_v28 = vpop.f32.mrf.mxu0 }
 0x188   :  { %240 = vrot.lane.b32.xlu2 %v159_v28, %s448_s30 }
 0x18c   :  { %v249_v41 = vpop.permute.xlu0 %248 }
 0x18f   :  { %v162_v30 = vpop.f32.mrf.mxu0 }
 0x190   :  { %242 = vrot.lane.b32.xlu1 %v162_v30, %s448_s30  ;;  %226 = vrot.lane.b32.xlu2 %v110_v29, %s445_s15  ;;  %s450_s15 = smov [#allocation2]  }
 0x191   :  { %s370_s16 = sshll.u32 %s450_s15, 4  ;;  %s371_s16 = int_to_ptr.vmem [resolvable:$true] %s370_s16 }
 0x194   :  { %v235_v48 = vpop.permute.xlu0 %234 }
 0x198   :  { %250 = vrot.lane.b32.xlu2 %v197_v31, %s447_s1 }
 0x1e2   :  { %v241_v40 = vpop.permute.xlu2 %240 }
 0x1e3   :  { %v262_v42 = vsel %vm261_vm3, %v259_v39, %v241_v40  ;;  %v411_v39 = vld [vmem:[%s608_s6 + $0x1] ss:$0 sm:$0xff] }
 0x1e4   :  { %v265_v43 = vsel %vm264_vm4, %v262_v42, %v249_v41 }
 0x1e5   :  { %396 = vmatmul.msk.f32.vlgmr.msrb.gmra.mxu2 %vm275_vm5, %v265_v43  ;;  %v412_v43 = vld [vmem:[%s608_s6 + $0x2] ss:$0 sm:$0xff] }
 0x1ea   :  { %v227_v45 = vpop.permute.xlu2 %226 }
 0x1eb   :  { %v258_v47 = vsel %vm31_vm0, %v256_v46, %v227_v45 }
 0x1ec   :  { %v260_v51 = vsel %vm170_vm1, %v258_v47, %v235_v48 }
 0x1f2   :  { %v251_v49 = vpop.permute.xlu2 %250 }
 0x202   :  { %v243_v50 = vpop.permute.xlu1 %242 }
 0x203   :  { %v263_v52 = vsel %vm261_vm3, %v260_v51, %v243_v50 }
 0x204   :  { %v266_v53 = vsel %vm264_vm4, %v263_v52, %v251_v49 }
 0x205   :  { %397 = vmatmul.msk.f32.gmra.mxu2 %vm275_vm5, %v266_v53 }
 0x268   :  { %v299_v55 = vpop.f32.mrf.mxu2 }
 0x269   :  { %v300_v58 = vadd.f32 %v410_v54, %v299_v55 }
 0x26b   :  { %v308_v61 = vmax.f32 %v300_v58, 0.0 }
 0x26d   :  { %v310_v1 = vsel %vm307_vm6, %v300_v58, %v308_v61 }
 0x26e   :  { %v312_v4 = vsel %vm31_vm0, %v310_v1, 0.0 }
 0x288   :  { %v302_v62 = vpop.f32.mrf.mxu2 }
 0x289   :  { %v303_v63 = vadd.f32 %v410_v54, %v302_v62 }
 0x28b   :  { %v309_v2 = vmax.f32 %v303_v63, 0.0 }
 0x28d   :  { %v311_v3 = vsel %vm307_vm6, %v303_v63, %v309_v2 }
 0x28e   :  { %v313_v5 = vsel %vm31_vm0, %v311_v3, 0.0 }
 0x28f   :  { %v314_v7 = vadd.f32 %v313_v5, %v312_v4 }
 0x291   :  { %v315_v8 = vrot.slane %v314_v7, 4 }
 0x293   :  { %v316_v10 = vadd.f32 %v315_v8, %v314_v7 }
 0x295   :  { %v317_v11 = vrot.slane %v316_v10, 2 }
 0x297   :  { %v318_v13 = vadd.f32 %v317_v11, %v316_v10 }
 0x299   :  { %v319_v14 = vrot.slane %v318_v13, 1 }
 0x29b   :  { %v320_v16 = vadd.f32 %v319_v14, %v318_v13 }
 0x29d   :  { %v328_v17 = vmul.f32 %v327_v15, %v320_v16 }
 0x29f   :  { %v329_v18 = vsub.f32 %v310_v1, %v328_v17  ;;  %v330_v19 = vsub.f32 %v311_v3, %v328_v17 }
 0x2a1   :  { %v331_v20 = vmul.f32 %v329_v18, %v329_v18  ;;  %v332_v21 = vmul.f32 %v330_v19, %v330_v19 }
 0x2a3   :  { %v333_v22 = vsel %vm31_vm0, %v331_v20, 0.0  ;;  %v334_v23 = vsel %vm31_vm0, %v332_v21, 0.0 }
 0x2a4   :  { %v335_v24 = vadd.f32 %v334_v23, %v333_v22 }
 0x2a6   :  { %v336_v25 = vrot.slane %v335_v24, 4 }
 0x2a8   :  { %v337_v26 = vadd.f32 %v336_v25, %v335_v24 }
 0x2aa   :  { %v338_v27 = vrot.slane %v337_v26, 2 }
 0x2ac   :  { %v339_v28 = vadd.f32 %v338_v27, %v337_v26 }
 0x2ae   :  { %v340_v29 = vrot.slane %v339_v28, 1 }
 0x2b0   :  { %v341_v30 = vadd.f32 %v340_v29, %v339_v28 }
 0x2b2   :  { %v342_v31 = vmul.f32 %v341_v30, %v327_v15 }
 0x2b4   :  { %v343_v32 = vadd.f32 1e-05, %v342_v31 }
 0x2b6   :  { %415 = vrsqrt.f32 %v343_v32  ;;  %vm350_vm9 = vweird.f32 %v343_v32 }
 0x2bc   :  { %v416_v33 = vpop.eup %415 }
 0x2bd   :  { %v345_v34 = vmul.f32 %v416_v33, %v343_v32  ;;  %vm351_vm8 = vweird.f32 %v416_v33 }
 0x2be   :  { %vm352_vm10 = vmor %vm350_vm9, %vm351_vm8 }
 0x2bf   :  { %v346_v35 = vmul.f32 %v416_v33, %v345_v34 }
 0x2c1   :  { %v347_v36 = vmul.f32 0.5, %v346_v35 }
 0x2c3   :  { %v348_v37 = vsub.f32 1.5, %v347_v36 }
 0x2c5   :  { %v349_v38 = vmul.f32 %v416_v33, %v348_v37 }
 0x2c7   :  { %v353_v40 = vsel %vm352_vm10, %v416_v33, %v349_v38 }
 0x2c8   :  { %v354_v41 = vmul.f32 %v353_v40, %v329_v18  ;;  %v355_v42 = vmul.f32 %v353_v40, %v330_v19 }
 0x2ca   :  { %v358_v44 = vmul.f32 %v411_v39, %v354_v41  ;;  %v359_v45 = vmul.f32 %v411_v39, %v355_v42 }
 0x2cc   :  { %v363_v46 = vadd.f32 %v412_v43, %v359_v45  ;;  %v362_v47 = vadd.f32 %v412_v43, %v358_v44 }
 0x2ce   :  { %365 = vst.msk [vmem:[#allocation2 + $0x8] sm:$0xff] %vm31_vm0, %v363_v46 }
 0x2cf   :  { %364 = vst.msk [vmem:[#allocation2] sm:$0xff] %vm31_vm0, %v362_v47 }
 0x2d0   :  { %378 = dma.vmem_to_hbm [thread:$0]  %s371_s16, 256, %s373_s19, [#allocation3], %s451_s20, %s451_s20, %s444_s11  }
 0x2d1   :  { %441 = dma.done.wait [#allocation3], 256  }
 0x2d2   :  { %442 = vsyncadd [#allocation3], 4294967040 }
 0x2d3   :  { %383 = vsyncpa [#allocation3], 1 }

</bundles_post_ra>
